<compile_context>
chip_gen: v7x
topology: tpu7x:2x2x1
jax: 0.10.0
libtpu: 0.0.40
codegen_flags: <defaults>
</compile_context>

<pallas_src>
import jax
import jax.numpy as jnp
import numpy as np
from jax.experimental import pallas as pl
from jax.experimental.pallas import tpu as pltpu


# --------------------------------------------------------------------------
# Kernel
# --------------------------------------------------------------------------
def _make_eq1net_kernel(n_eq_layers: int):
    """Build a kernel closed over the (static) number of equivariant layers."""

    def kernel(xcat_ref, xfeat_ref, embed_ref, *refs):
        # refs = [Wcat_0, b_0, ..., Wcat_{L-1}, b_{L-1}, w_out, b_out, o_ref]
        #   Wcat_l = concat([Wid_l, Wsum_l], axis=0)  -> (2*C_l, C_{l+1})
        o_ref = refs[-1]
        b_out_ref = refs[-2]
        w_out_ref = refs[-3]
        layer_refs = refs[:-3]

        tb, M = xcat_ref.shape
        nembed, E = embed_ref.shape

        # ---- embedding gather as a one-hot matmul on the MXU ----
        idx = xcat_ref[...]                                        # (tb, M) i32
        iota = jax.lax.broadcasted_iota(jnp.int32, (tb, M, nembed), 2)
        onehot = (idx[:, :, None] == iota).astype(jnp.float32)     # (tb, M, V)
        emb = jnp.dot(onehot.reshape(tb * M, nembed),
                      embed_ref[...].astype(jnp.float32),
                      preferred_element_type=jnp.float32).reshape(tb, M, E)

        # ---- concat the scalar feature channel ----
        x = jnp.concatenate(
            [emb, xfeat_ref[...][:, :, None].astype(jnp.float32)], axis=-1)
        # x: (tb, M, E+1)

        # ---- Eq1to1 chain: both basis ops fused into one matmul ----
        for l in range(n_eq_layers):
            w = layer_refs[2 * l][...].astype(jnp.float32)         # (2C, C_out)
            bias = layer_refs[2 * l + 1][...].astype(jnp.float32)  # (1, C_out)
            c = x.shape[-1]
            s = jnp.sum(x, axis=1, keepdims=True)                  # (tb, 1, c)
            x_aug = jnp.concatenate(
                [x, jnp.broadcast_to(s, (tb, M, c))], axis=-1)     # (tb, M, 2c)
            y = jnp.dot(x_aug.reshape(tb * M, 2 * c), w,
                        preferred_element_type=jnp.float32) + bias
            # ReLU between layers; the outer F.relu on the last layer is
            # idempotent with this (relu(relu(x)) == relu(x)).
            x = jnp.maximum(y, 0.0).reshape(tb, M, w.shape[-1])

        # ---- x.sum(dim=-2) followed by Linear(out_dim, 1), done on the VPU ----
        z = jnp.sum(x, axis=1)                                     # (tb, out_dim)
        out = jnp.sum(z * w_out_ref[...].astype(jnp.float32), axis=-1,
                      keepdims=True) + b_out_ref[...]              # (tb, 1)
        o_ref[...] = out.astype(o_ref.dtype)

    return kernel


# --------------------------------------------------------------------------
# Parameters (shapes mirror the PyTorch module)
# --------------------------------------------------------------------------
def init_eq1net_params(key, nembed, embed_dim, layers, out_dim):
    dims = list(layers) + [out_dim]          # channel dims of the eq chain
    assert dims[0] == embed_dim + 1, "first eq-layer dim must be embed_dim + 1"

    keys = jax.random.split(key, 2 + 2 * (len(dims) - 1))
    params = {}
    params['embed'] = jax.random.normal(keys[0], (nembed, embed_dim),
                                        jnp.float32)               # nn.Embedding
    eq_layers = []
    for i, (din, dout) in enumerate(zip(dims[:-1], dims[1:])):
        std = np.sqrt(2.0 / (din + dout + 2))
        wid = std * jax.random.normal(keys[2 + 2 * i], (din, dout), jnp.float32)
        wsum = std * jax.random.normal(keys[3 + 2 * i], (din, dout), jnp.float32)
        bias = jnp.zeros((dout,), jnp.float32)
        eq_layers.append((wid, wsum, bias))
    params['eq_layers'] = eq_layers
    # nn.Linear(out_dim, 1)
    bound = 1.0 / np.sqrt(out_dim)
    params['w_out'] = bound * jax.random.normal(keys[1], (out_dim, 1), jnp.float32)
    params['b_out'] = jnp.zeros((1, 1), jnp.float32)
    return params


# --------------------------------------------------------------------------
# Wrapper: batch-tiled, pipelined pallas_call
# --------------------------------------------------------------------------
def eq1net_forward(params, xcat, xfeat, *, tile_b=None):
    B, M = xcat.shape
    eq_layers = params['eq_layers']

    # Largest channel width along the chain (for the VMEM tile heuristic).
    dims = [eq_layers[0][0].shape[0]] + [w.shape[1] for w, _, _ in eq_layers]
    max_c = max(dims + [params['w_out'].shape[0]])

    if tile_b is None:
        # Keep per-tile activations (x, x_aug, y: ~4x widest channel, f32)
        # well under the scoped-VMEM budget, leaving room for double-buffered
        # xcat/xfeat/out tiles and the resident weights.
        budget = 6 << 20
        per_row = M * max_c * 4 * 4
        tile_b = max(1, min(B, budget // max(per_row, 1)))
        if tile_b >= 8:
            tile_b = (tile_b // 8) * 8
    grid = (pl.cdiv(B, tile_b),)

    def const_spec(shape):
        return pl.BlockSpec(shape, lambda i: (0,) * len(shape))

    inputs = [xcat.astype(jnp.int32), xfeat.astype(jnp.float32), params['embed']]
    in_specs = [
        pl.BlockSpec((tile_b, M), lambda i: (i, 0)),   # xcat   (batch tile)
        pl.BlockSpec((tile_b, M), lambda i: (i, 0)),   # xfeat  (batch tile)
        const_spec(params['embed'].shape),             # embed table (resident)
    ]
    for wid, wsum, bias in eq_layers:
        wcat = jnp.concatenate([wid, wsum], axis=0)    # (2*C_in, C_out)
        b2d = bias.reshape(1, -1)
        inputs += [wcat, b2d]
        in_specs += [const_spec(wcat.shape), const_spec(b2d.shape)]
    w_out_row = params['w_out'].reshape(1, -1)         # (1, out_dim)
    b_out = params['b_out'].reshape(1, 1)
    inputs += [w_out_row, b_out]
    in_specs += [const_spec(w_out_row.shape), const_spec((1, 1))]

    return pl.pallas_call(
        _make_eq1net_kernel(len(eq_layers)),
        grid=grid,
        out_shape=jax.ShapeDtypeStruct((B, 1), jnp.float32),
        in_specs=in_specs,
        out_specs=pl.BlockSpec((tile_b, 1), lambda i: (i, 0)),
        compiler_params=pltpu.CompilerParams(
            dimension_semantics=("parallel",),
            vmem_limit_bytes=32 * 1024 * 1024),
    )(*inputs)


# --------------------------------------------------------------------------
# Pure-JAX reference (non-fused formulation) for a correctness check
# --------------------------------------------------------------------------
def eq1net_reference(params, xcat, xfeat):
    emb = jnp.take(params['embed'], xcat, axis=0)
    x = jnp.concatenate([emb, xfeat[..., None].astype(jnp.float32)], axis=-1)
    for wid, wsum, bias in params['eq_layers']:
        y = jnp.einsum('bmd,ds->bms', x, wid)
        y = y + jnp.einsum('bd,ds->bs', jnp.sum(x, axis=1), wsum)[:, None, :]
        y = y + bias[None, None, :]
        x = jnp.maximum(y, 0.0)
    z = jnp.sum(x, axis=1)
    return z @ params['w_out'] + params['b_out']


if __name__ == "__main__":
    # Small shapes consistent with the module; B=16 with tile_b=8 exercises a
    # 2-step pipelined grid over the batch axis.
    B, M = 16, 8                 # batch, set size
    nembed, embed_dim = 10, 7    # -> eq-net input channels = 8
    layers = [embed_dim + 1, 32] # Eq1to1 channel dims
    out_dim = 16

    key = jax.random.PRNGKey(0)
    kp, kc, kf = jax.random.split(key, 3)
    params = init_eq1net_params(kp, nembed, embed_dim, layers, out_dim)

    xcat = jax.random.randint(kc, (B, M), 0, nembed, dtype=jnp.int32)
    xfeat = jax.random.normal(kf, (B, M), jnp.float32)

    out = eq1net_forward(params, xcat, xfeat, tile_b=8)
    out = jax.block_until_ready(out)

    ref = jax.block_until_ready(eq1net_reference(params, xcat, xfeat))
    assert out.shape == (B, 1)
    np.testing.assert_allclose(np.asarray(out), np.asarray(ref),
                               rtol=1e-3, atol=1e-3)
    print("KERNEL_OK")
</pallas_src>

<mosaic_0001>
module attributes {stable_mosaic.version = 11 : i64} {
  func.func @kernel(%arg0: i32, %arg1: memref<8x8xi32, #tpu.memory_space<vmem>>, %arg2: memref<8x8xf32, #tpu.memory_space<vmem>>, %arg3: memref<10x7xf32, #tpu.memory_space<vmem>>, %arg4: memref<16x32xf32, #tpu.memory_space<vmem>>, %arg5: memref<1x32xf32, #tpu.memory_space<vmem>>, %arg6: memref<64x16xf32, #tpu.memory_space<vmem>>, %arg7: memref<1x16xf32, #tpu.memory_space<vmem>>, %arg8: memref<1x16xf32, #tpu.memory_space<vmem>>, %arg9: memref<1x1xf32, #tpu.memory_space<vmem>>, %arg10: memref<8x1xf32, #tpu.memory_space<vmem>>) attributes {dimension_semantics = [#tpu.dimension_semantics<parallel>], iteration_bounds = array<i64: 2>, scalar_prefetch = 0 : i64, scratch_operands = 0 : i64, tpu.core_type = #tpu.core_type<tc>, window_params = [{transform_indices = @transform_0, window_bounds = array<i64: 8, 8>}, {transform_indices = @transform_1, window_bounds = array<i64: 8, 8>}, {pipeline_mode = #tpu.pipeline_mode<synchronous>, transform_indices = @transform_2, window_bounds = array<i64: 10, 7>}, {pipeline_mode = #tpu.pipeline_mode<synchronous>, transform_indices = @transform_3, window_bounds = array<i64: 16, 32>}, {pipeline_mode = #tpu.pipeline_mode<synchronous>, transform_indices = @transform_4, window_bounds = array<i64: 1, 32>}, {pipeline_mode = #tpu.pipeline_mode<synchronous>, transform_indices = @transform_5, window_bounds = array<i64: 64, 16>}, {pipeline_mode = #tpu.pipeline_mode<synchronous>, transform_indices = @transform_6, window_bounds = array<i64: 1, 16>}, {pipeline_mode = #tpu.pipeline_mode<synchronous>, transform_indices = @transform_7, window_bounds = array<i64: 1, 16>}, {pipeline_mode = #tpu.pipeline_mode<synchronous>, transform_indices = @transform_8, window_bounds = array<i64: 1, 1>}, {transform_indices = @transform_9, window_bounds = array<i64: 8, 1>}]} {
    %c0 = arith.constant 0 : index
    %c0_0 = arith.constant 0 : index
    %0 = vector.load %arg1[%c0, %c0_0] : memref<8x8xi32, #tpu.memory_space<vmem>>, vector<8x8xi32>
    %1 = tpu.iota {dimensions = array<i32: 2>} : vector<8x8x10xi32>
    %2 = vector.shape_cast %0 : vector<8x8xi32> to vector<8x8x1xi32>
    %3 = vector.broadcast %2 : vector<8x8x1xi32> to vector<8x8x10xi32>
    %4 = arith.cmpi eq, %3, %1 : vector<8x8x10xi32>
    %5 = arith.extui %4 : vector<8x8x10xi1> to vector<8x8x10xi32>
    %6 = arith.sitofp %5 : vector<8x8x10xi32> to vector<8x8x10xf32>
    %7 = vector.shape_cast %6 : vector<8x8x10xf32> to vector<64x10xf32>
    %c0_1 = arith.constant 0 : index
    %c0_2 = arith.constant 0 : index
    %8 = vector.load %arg3[%c0_1, %c0_2] : memref<10x7xf32, #tpu.memory_space<vmem>>, vector<10x7xf32>
    %cst = arith.constant dense<0.000000e+00> : vector<64x7xf32>
    %9 = tpu.matmul %7, %8, %cst {dimension_numbers = #tpu.dot_dimension_numbers<[1], [0], [0], [1], [0, 0, 1, 1], [], []>} : vector<64x10xf32>, vector<10x7xf32>, vector<64x7xf32> -> vector<64x7xf32>
    %10 = vector.shape_cast %9 : vector<64x7xf32> to vector<8x8x7xf32>
    %c0_3 = arith.constant 0 : index
    %c0_4 = arith.constant 0 : index
    %11 = vector.load %arg2[%c0_3, %c0_4] : memref<8x8xf32, #tpu.memory_space<vmem>>, vector<8x8xf32>
    %12 = vector.shape_cast %11 : vector<8x8xf32> to vector<8x8x1xf32>
    %13 = tpu.concatenate %10, %12 in 2 : vector<8x8x7xf32>, vector<8x8x1xf32> -> vector<8x8x8xf32>
    %c0_5 = arith.constant 0 : index
    %c0_6 = arith.constant 0 : index
    %14 = vector.load %arg4[%c0_5, %c0_6] : memref<16x32xf32, #tpu.memory_space<vmem>>, vector<16x32xf32>
    %c0_7 = arith.constant 0 : index
    %c0_8 = arith.constant 0 : index
    %15 = vector.load %arg5[%c0_7, %c0_8] : memref<1x32xf32, #tpu.memory_space<vmem>>, vector<1x32xf32>
    %cst_9 = arith.constant dense<0.000000e+00> : vector<8x8xf32>
    %16 = vector.multi_reduction <add>, %13, %cst_9 [1] : vector<8x8x8xf32> to vector<8x8xf32>
    %17 = vector.shape_cast %16 : vector<8x8xf32> to vector<8x1x8xf32>
    %18 = vector.shape_cast %17 : vector<8x1x8xf32> to vector<8x1x8xf32>
    %19 = vector.broadcast %18 : vector<8x1x8xf32> to vector<8x8x8xf32>
    %20 = tpu.concatenate %13, %19 in 2 : vector<8x8x8xf32>, vector<8x8x8xf32> -> vector<8x8x16xf32>
    %21 = vector.shape_cast %20 : vector<8x8x16xf32> to vector<64x16xf32>
    %cst_10 = arith.constant dense<0.000000e+00> : vector<64x32xf32>
    %22 = tpu.matmul %21, %14, %cst_10 {dimension_numbers = #tpu.dot_dimension_numbers<[1], [0], [0], [1], [0, 0, 1, 1], [], []>} : vector<64x16xf32>, vector<16x32xf32>, vector<64x32xf32> -> vector<64x32xf32>
    %23 = vector.broadcast %15 : vector<1x32xf32> to vector<64x32xf32>
    %24 = arith.addf %22, %23 : vector<64x32xf32>
    %cst_11 = arith.constant 0.000000e+00 : f32
    %25 = vector.broadcast %cst_11 : f32 to vector<64x32xf32>
    %26 = arith.maximumf %24, %25 : vector<64x32xf32>
    %27 = vector.shape_cast %26 : vector<64x32xf32> to vector<8x8x32xf32>
    %c0_12 = arith.constant 0 : index
    %c0_13 = arith.constant 0 : index
    %28 = vector.load %arg6[%c0_12, %c0_13] : memref<64x16xf32, #tpu.memory_space<vmem>>, vector<64x16xf32>
    %c0_14 = arith.constant 0 : index
    %c0_15 = arith.constant 0 : index
    %29 = vector.load %arg7[%c0_14, %c0_15] : memref<1x16xf32, #tpu.memory_space<vmem>>, vector<1x16xf32>
    %cst_16 = arith.constant dense<0.000000e+00> : vector<8x32xf32>
    %30 = vector.multi_reduction <add>, %27, %cst_16 [1] : vector<8x8x32xf32> to vector<8x32xf32>
    %31 = vector.shape_cast %30 : vector<8x32xf32> to vector<8x1x32xf32>
    %32 = vector.shape_cast %31 : vector<8x1x32xf32> to vector<8x1x32xf32>
    %33 = vector.broadcast %32 : vector<8x1x32xf32> to vector<8x8x32xf32>
    %34 = tpu.concatenate %27, %33 in 2 : vector<8x8x32xf32>, vector<8x8x32xf32> -> vector<8x8x64xf32>
    %35 = vector.shape_cast %34 : vector<8x8x64xf32> to vector<64x64xf32>
    %cst_17 = arith.constant dense<0.000000e+00> : vector<64x16xf32>
    %36 = tpu.matmul %35, %28, %cst_17 {dimension_numbers = #tpu.dot_dimension_numbers<[1], [0], [0], [1], [0, 0, 1, 1], [], []>} : vector<64x64xf32>, vector<64x16xf32>, vector<64x16xf32> -> vector<64x16xf32>
    %37 = vector.broadcast %29 : vector<1x16xf32> to vector<64x16xf32>
    %38 = arith.addf %36, %37 : vector<64x16xf32>
    %cst_18 = arith.constant 0.000000e+00 : f32
    %39 = vector.broadcast %cst_18 : f32 to vector<64x16xf32>
    %40 = arith.maximumf %38, %39 : vector<64x16xf32>
    %41 = vector.shape_cast %40 : vector<64x16xf32> to vector<8x8x16xf32>
    %cst_19 = arith.constant dense<0.000000e+00> : vector<8x16xf32>
    %42 = vector.multi_reduction <add>, %41, %cst_19 [1] : vector<8x8x16xf32> to vector<8x16xf32>
    %c0_20 = arith.constant 0 : index
    %c0_21 = arith.constant 0 : index
    %43 = vector.load %arg8[%c0_20, %c0_21] : memref<1x16xf32, #tpu.memory_space<vmem>>, vector<1x16xf32>
    %44 = vector.broadcast %43 : vector<1x16xf32> to vector<8x16xf32>
    %45 = arith.mulf %42, %44 : vector<8x16xf32>
    %cst_22 = arith.constant dense<0.000000e+00> : vector<8xf32>
    %46 = vector.multi_reduction <add>, %45, %cst_22 [1] : vector<8x16xf32> to vector<8xf32>
    %47 = vector.shape_cast %46 : vector<8xf32> to vector<8x1xf32>
    %c0_23 = arith.constant 0 : index
    %c0_24 = arith.constant 0 : index
    %48 = vector.load %arg9[%c0_23, %c0_24] : memref<1x1xf32, #tpu.memory_space<vmem>>, vector<1x1xf32>
    %49 = vector.broadcast %48 : vector<1x1xf32> to vector<8x1xf32>
    %50 = arith.addf %47, %49 : vector<8x1xf32>
    %c0_25 = arith.constant 0 : index
    %c0_26 = arith.constant 0 : index
    %51 = vector.load %arg10[%c0_25, %c0_26] : memref<8x1xf32, #tpu.memory_space<vmem>>, vector<8x1xf32>
    tpu.vector_store %arg10[%c0_25, %c0_26], %50 {strides = array<i32>} : memref<8x1xf32, #tpu.memory_space<vmem>>, vector<8x1xf32>,
    return
  }
  func.func @transform_0(%arg0: i32) -> (i32, i32) {
    %c0_i32 = arith.constant 0 : i32
    %c0_i32_0 = arith.constant 0 : i32
    return %arg0, %c0_i32 : i32, i32
  }
  func.func @transform_1(%arg0: i32) -> (i32, i32) {
    %c0_i32 = arith.constant 0 : i32
    %c0_i32_0 = arith.constant 0 : i32
    return %arg0, %c0_i32 : i32, i32
  }
  func.func @transform_2(%arg0: i32) -> (i32, i32) {
    %c0_i32 = arith.constant 0 : i32
    %c0_i32_0 = arith.constant 0 : i32
    %c0_i32_1 = arith.constant 0 : i32
    return %c0_i32, %c0_i32_0 : i32, i32
  }
  func.func @transform_3(%arg0: i32) -> (i32, i32) {
    %c0_i32 = arith.constant 0 : i32
    %c0_i32_0 = arith.constant 0 : i32
    %c0_i32_1 = arith.constant 0 : i32
    return %c0_i32, %c0_i32_0 : i32, i32
  }
  func.func @transform_4(%arg0: i32) -> (i32, i32) {
    %c0_i32 = arith.constant 0 : i32
    %c0_i32_0 = arith.constant 0 : i32
    %c0_i32_1 = arith.constant 0 : i32
    return %c0_i32, %c0_i32_0 : i32, i32
  }
  func.func @transform_5(%arg0: i32) -> (i32, i32) {
    %c0_i32 = arith.constant 0 : i32
    %c0_i32_0 = arith.constant 0 : i32
    %c0_i32_1 = arith.constant 0 : i32
    return %c0_i32, %c0_i32_0 : i32, i32
  }
  func.func @transform_6(%arg0: i32) -> (i32, i32) {
    %c0_i32 = arith.constant 0 : i32
    %c0_i32_0 = arith.constant 0 : i32
    %c0_i32_1 = arith.constant 0 : i32
    return %c0_i32, %c0_i32_0 : i32, i32
  }
  func.func @transform_7(%arg0: i32) -> (i32, i32) {
    %c0_i32 = arith.constant 0 : i32
    %c0_i32_0 = arith.constant 0 : i32
    %c0_i32_1 = arith.constant 0 : i32
    return %c0_i32, %c0_i32_0 : i32, i32
  }
  func.func @transform_8(%arg0: i32) -> (i32, i32) {
    %c0_i32 = arith.constant 0 : i32
    %c0_i32_0 = arith.constant 0 : i32
    %c0_i32_1 = arith.constant 0 : i32
    return %c0_i32, %c0_i32_0 : i32, i32
  }
  func.func @transform_9(%arg0: i32) -> (i32, i32) {
    %c0_i32 = arith.constant 0 : i32
    %c0_i32_0 = arith.constant 0 : i32
    return %arg0, %c0_i32 : i32, i32
  }
}

</mosaic_0001>

<bundles_post_ra>
// kernel: tpu_custom_call.1
= control target key start
LH: loop header
LB: loop body
LE: loop exit
PB: predicated region body
PF: predicated region fallthrough
CT: control target
= control target key end

     0   :  { %s1559_s11 = smov 0   ;;  %s1801_s0 = inlined_call_operand.vmem [shape: s32[16,8], index: 0, kind: input, shape index: {}]   ;;  %s1802_s1 = inlined_call_operand.vmem [shape: f32[16,8], index: 1, kind: input, shape index: {}]   ;;  %s1803_s2 = inlined_call_operand.vmem [shape: f32[10,7], index: 2, kind: input, shape index: {}]   ;;  %s1804_s3 = inlined_call_operand.vmem [shape: f32[16,32], index: 3, kind: input, shape index: {}]   ;;  %s1805_s4 = inlined_call_operand.vmem [shape: f32[1,32], index: 4, kind: input, shape index: {}]   ;;  %s1806_s5 = inlined_call_operand.vmem [shape: f32[64,16], index: 5, kind: input, shape index: {}]   ;;  %s1807_s6 = inlined_call_operand.vmem [shape: f32[1,16], index: 6, kind: input, shape index: {}]   ;;  %s1808_s7 = inlined_call_operand.vmem [shape: f32[1,16], index: 7, kind: input, shape index: {}]   ;;  %s1809_s8 = inlined_call_operand.<no memory space> [shape: f32[1,1], index: 8, kind: input, shape index: {}]   ;;  %s1810_s9 = inlined_call_operand.vmem [shape: f32[16,1], index: 9, kind: output, shape index: {}]  }
   0x1   :  { %v14_v0 = vstv %s1809_s8 }
   0x2   :  { %15 = vst [vmem:[#allocation2] sm:$0x1] %v14_v0 }
   0x3 LB: > { %s1305_s12 = sadd.s32 4294967295, %s1500_s11   ;;  %p1309_p0 = scmp.ge.s32.totalorder %s1500_s11, 1  ;;  %s1500_s11 = sphi %s1559_s11, %s21_s11  }
   0x4   : > { %p297_p1 = scmp.lt.s32.totalorder %s1500_s11, 3 }
   0x6   : > { %p298_p2 = pnand %p1309_p0, %p297_p1 }
   0x7   : > { %p335_p3 = scmp.lt.s32.totalorder (!%p298_p2), %s1305_s12, 1  ;;  %v348_v1 = vlaneseq (!%p298_p2)  ;;  %v430_v2 = vld [vmem:[%s1803_s2] sm:$0xff] (!%p298_p2)  ;;  %v431_v3 = vld [vmem:[%s1803_s2 + $0x8] sm:$0x3] (!%p298_p2)  ;;  %vm457_vm0 = vcmask (!%p298_p2), 1041408   ;;  %vm1502_vm1 = vmmov (!%p298_p2), 1  }
   0x8   : > { %301 = sbr.rel (%p298_p2) target bundleno = 1234 (0x4d2), region = 56  ;;  %v1448_v4 = vpack.c.bf16 (!%p298_p2), %v431_v3, %v430_v2  ;;  %vm1449_vm2 = vmpackc.low (!%p298_p2), %vm457_vm0, %vm1502_vm1  ;;  %vm432_vm3 = vcmask (!%p298_p2), 80896   ;;  %v1503_v35 = vmov (!%p298_p2), 0.0   ;;  %v632_v50 = vld [vmem:[%s1804_s3] sm:$0xff] (!%p298_p2)  ;;  %v633_v51 = vld [vmem:[%s1804_s3 + $0x8] sm:$0xff] (!%p298_p2)  ;;  %vm623_vm12 = vcmask (!%p298_p2), 56320  }
   0x9   : > { %v351_v5 = vshrl.u32 (!%p298_p2), %v348_v1, 7  ;;  %v349_v32 = vand.u32 (!%p298_p2), 127, %v348_v1  ;;  %v1454_v52 = vpack.c.bf16 (!%p298_p2), %v633_v51, %v632_v50  ;;  %vm635_vm13 = vcmask (!%p298_p2), 64512   ;;  %s1504_s27 = smov (!%p298_p2), 8   ;;  %s1505_s26 = smov (!%p298_p2), 32  }
   0xa   : > { %1450 = vmatprep.subr.msk.bf16.mxu0 (!%p298_p2), %vm1449_vm2, %v1448_v4  ;;  %vm738_vm14 = vcmask (!%p298_p2), 130048   ;;  %vm885_vm15 = vcmask (!%p298_p2), 261120   ;;  %vm988_vm0 = vcmask (!%p298_p2), 523264   ;;  %vm1206_vm1 = vcmask (!%p298_p2), 1041409  }
   0xb   : > { %v352_v6 = vsub.s32 (!%p298_p2), 0, %v351_v5  ;;  %v366_v7 = vsub.s32 (!%p298_p2), 2, %v351_v5  ;;  %1453 = vmatpush3.bf16.msk.msra.mxu0 (!%p298_p2), %vm1449_vm2, %v1448_v4  ;;  %v359_v8 = vsub.s32 (!%p298_p2), 1, %v351_v5  ;;  %v373_v9 = vsub.s32 (!%p298_p2), 3, %v351_v5  ;;  %1455 = vmatprep.subr.bf16.mxu1 (!%p298_p2), %v1454_v52 }
   0xc   : > { %v380_v15 = vsub.s32 (!%p298_p2), 4, %v351_v5  ;;  %v387_v16 = vsub.s32 (!%p298_p2), 5, %v351_v5  ;;  %v394_v19 = vsub.s32 (!%p298_p2), 6, %v351_v5  ;;  %v401_v20 = vsub.s32 (!%p298_p2), 7, %v351_v5  ;;  %1457 = vmatpush3.bf16.msra.mxu1 (!%p298_p2), %v1454_v52 }
   0xd   : > { %vm1209_vm2 = vcmask (!%p298_p2), 1042434  }
   0xf   : > { %s1812_s12 = smov (!%p335_p3, %s1305_s12), 1 }
  0x10   : > { %s1573_s16 = sshll.u32 %s1812_s12, 3 }
  0x11   : > { %s338_s19 = scalar_lea.vmem %s1801_s0, %s1573_s16  ;;  %s342_s22 = scalar_lea.vmem %s1802_s1, %s1573_s16 }
  0x12   : > { %v347_v10 = vld [vmem:[%s338_s19] sm:$0xff]  ;;  %s346_s13 = scalar_lea.vmem %s1810_s9, %s1573_s16 }
  0x13   : > { %v353_v11 = vrot.slane %v347_v10, %v352_v6  ;;  %v367_v12 = vrot.slane %v347_v10, %v366_v7  ;;  %v360_v13 = vrot.slane %v347_v10, %v359_v8  ;;  %v374_v14 = vrot.slane %v347_v10, %v373_v9  ;;  %v566_v23 = vld [vmem:[%s342_s22] sm:$0xff] }
  0x14   : > { %v381_v17 = vrot.slane %v347_v10, %v380_v15  ;;  %v388_v18 = vrot.slane %v347_v10, %v387_v16  ;;  %v395_v21 = vrot.slane %v347_v10, %v394_v19  ;;  %v402_v22 = vrot.slane %v347_v10, %v401_v20 }
  0x15   : > { %355 = vbcast.lane.b32.xlu0 %v353_v11, 256  ;;  %369 = vbcast.lane.b32.xlu1 %v367_v12, 256  ;;  %v577_v24 = vrot.slane %v566_v23, %v359_v8  ;;  %v570_v25 = vrot.slane %v566_v23, %v352_v6  ;;  %v591_v26 = vrot.slane %v566_v23, %v373_v9 }
  0x16   : > { %v584_v27 = vrot.slane %v566_v23, %v366_v7  ;;  %v605_v28 = vrot.slane %v566_v23, %v387_v16  ;;  %v598_v29 = vrot.slane %v566_v23, %v380_v15  ;;  %v619_v30 = vrot.slane %v566_v23, %v401_v20 }
  0x17   : > { %v612_v31 = vrot.slane %v566_v23, %v394_v19 }
  0x19   : > { %362 = vbcast.lane.b32.xlu0 %v360_v13, 256  ;;  %376 = vbcast.lane.b32.xlu1 %v374_v14, 256 }
  0x1d   : > { %383 = vbcast.lane.b32.xlu0 %v381_v17, 256  ;;  %390 = vbcast.lane.b32.xlu1 %v388_v18, 256 }
  0x21   : > { %397 = vbcast.lane.b32.xlu0 %v395_v21, 256  ;;  %404 = vbcast.lane.b32.xlu1 %v402_v22, 256 }
  0x25   : > { %579 = vbcast.lane.b32.xlu1 %v577_v24, 256  ;;  %572 = vbcast.lane.b32.xlu0 %v570_v25, 256 }
  0x29   : > { %593 = vbcast.lane.b32.xlu1 %v591_v26, 256  ;;  %586 = vbcast.lane.b32.xlu0 %v584_v27, 256 }
  0x2d   : > { %607 = vbcast.lane.b32.xlu1 %v605_v28, 256  ;;  %600 = vbcast.lane.b32.xlu0 %v598_v29, 256 }
  0x31   : > { %621 = vbcast.lane.b32.xlu1 %v619_v30, 256  ;;  %614 = vbcast.lane.b32.xlu0 %v612_v31, 256 }
  0x87   : > { %v356_v33 = vpop.permute.xlu0 %355  ;;  %v370_v34 = vpop.permute.xlu1 %369 }
  0x88   : > { %vm406_vm4 = vcmp.eq.s32.totalorder %v356_v33, %v349_v32  ;;  %vm408_vm5 = vcmp.eq.s32.totalorder %v370_v34, %v349_v32 }
  0x89   : > { %v1313_v36 = vsel %vm406_vm4, 1.0, %v1503_v35  ;;  %v1315_v39 = vsel %vm408_vm5, 1.0, %v1503_v35  ;;  %vm1215_vm4 = vcmask 1044484   ;;  %vm1218_vm5 = vcmask 1045509  }
  0x8a   : > { %1392 = vmatprep.mubr.msk.f32.mxu0 %vm432_vm3, %v1313_v36 }
  0x8b   : > { %v363_v37 = vpop.permute.xlu0 %362  ;;  %v377_v38 = vpop.permute.xlu1 %376 }
  0x8c   : > { %vm407_vm6 = vcmp.eq.s32.totalorder %v363_v37, %v349_v32  ;;  %vm409_vm7 = vcmp.eq.s32.totalorder %v377_v38, %v349_v32 }
  0x8d   : > { %v1314_v40 = vsel %vm407_vm6, 1.0, %v1503_v35  ;;  %v1316_v41 = vsel %vm409_vm7, 1.0, %v1503_v35  ;;  %vm1221_vm6 = vcmask 1046534   ;;  %vm1224_vm7 = vcmask 1047559  }
  0x8e   : > { %1393 = vmatmul.mubr.msk.f32.vlgmr.msra.gmra.mrb[0].mxu0 %vm432_vm3, %v1314_v40 }
  0x8f   : > { %1395 = vmatprep.mubr.msk.f32.mxu0 %vm432_vm3, %v1315_v39  ;;  %v384_v42 = vpop.permute.xlu0 %383  ;;  %v391_v43 = vpop.permute.xlu1 %390 }
  0x90   : > { %vm410_vm8 = vcmp.eq.s32.totalorder %v384_v42, %v349_v32  ;;  %vm411_vm9 = vcmp.eq.s32.totalorder %v391_v43, %v349_v32 }
  0x91   : > { %v1317_v44 = vsel %vm410_vm8, 1.0, %v1503_v35  ;;  %v1318_v45 = vsel %vm411_vm9, 1.0, %v1503_v35  ;;  %vm1238_vm8 = vcmask 7168  }
  0x92   : > { %1396 = vmatmul.mubr.msk.f32.gmra.mrb[2].mxu0 %vm432_vm3, %v1316_v41 }
  0x93   : > { %1398 = vmatprep.mubr.msk.f32.mxu0 %vm432_vm3, %v1317_v44  ;;  %v398_v46 = vpop.permute.xlu0 %397  ;;  %v405_v47 = vpop.permute.xlu1 %404 }
  0x94   : > { %vm412_vm10 = vcmp.eq.s32.totalorder %v398_v46, %v349_v32  ;;  %vm413_vm11 = vcmp.eq.s32.totalorder %v405_v47, %v349_v32 }
  0x95   : > { %v1319_v48 = vsel %vm412_vm10, 1.0, %v1503_v35  ;;  %v1320_v49 = vsel %vm413_vm11, 1.0, %v1503_v35 }
  0x96   : > { %1399 = vmatmul.mubr.msk.f32.gmra.mrb[4].mxu0 %vm432_vm3, %v1318_v45 }
  0x97   : > { %1401 = vmatprep.mubr.msk.f32.mxu0 %vm432_vm3, %v1319_v48  ;;  %v580_v53 = vpop.permute.xlu1 %579  ;;  %v573_v54 = vpop.permute.xlu0 %572 }
  0x9a   : > { %1402 = vmatmul.mubr.msk.f32.gmra.mrb[6].mxu0 %vm432_vm3, %v1320_v49  ;;  %vm1212_vm3 = vcmask 1043459  }
  0x9b   : > { %v594_v55 = vpop.permute.xlu1 %593  ;;  %v587_v56 = vpop.permute.xlu0 %586 }
  0x9f   : > { %v608_v2 = vpop.permute.xlu1 %607  ;;  %v601_v6 = vpop.permute.xlu0 %600 }
  0xa3   : > { %v622_v24 = vpop.permute.xlu1 %621  ;;  %v615_v28 = vpop.permute.xlu0 %614 }
 0x161   : > { %v1394_v57 = vpop.f32.mrb[0].mxu0 }
 0x162   : > { %v1598_v58 = vsel %vm623_vm12, %v1394_v57, %v580_v53  ;;  %v527_v59 = vpop.f32.mrb[1].mxu0 }
 0x163   : > { %v643_v60 = vsel %vm635_vm13, %v1598_v58, 0.0  ;;  %v1603_v61 = vsel %vm623_vm12, %v527_v59, %v573_v54 }
 0x164   : > { %v644_v62 = vrot.slane %v643_v60, 4  ;;  %v636_v63 = vsel %vm635_vm13, %v1603_v61, 0.0 }
 0x165   : > { %v637_v0 = vrot.slane %v636_v63, 4  ;;  %v1397_v1 = vpop.f32.mrb[2].mxu0 }
 0x166   : > { %v645_v3 = vadd.f32 %v644_v62, %v643_v60  ;;  %v1608_v4 = vsel %vm623_vm12, %v1397_v1, %v594_v55  ;;  %v537_v5 = vpop.f32.mrb[3].mxu0 }
 0x167   : > { %v638_v7 = vadd.f32 %v637_v0, %v636_v63  ;;  %v657_v8 = vsel %vm635_vm13, %v1608_v4, 0.0  ;;  %v1613_v9 = vsel %vm623_vm12, %v537_v5, %v587_v56 }
 0x168   : > { %v646_v10 = vrot.slane %v645_v3, 2  ;;  %v658_v11 = vrot.slane %v657_v8, 4  ;;  %v650_v12 = vsel %vm635_vm13, %v1613_v9, 0.0 }
 0x169   : > { %v639_v13 = vrot.slane %v638_v7, 2  ;;  %v651_v14 = vrot.slane %v650_v12, 4  ;;  %v1400_v15 = vpop.f32.mrb[4].mxu0 }
 0x16a   : > { %v647_v16 = vadd.f32 %v646_v10, %v645_v3  ;;  %v659_v17 = vadd.f32 %v658_v11, %v657_v8  ;;  %v1618_v18 = vsel %vm623_vm12, %v1400_v15, %v608_v2  ;;  %v547_v19 = vpop.f32.mrb[5].mxu0 }
 0x16b   : > { %v640_v20 = vadd.f32 %v639_v13, %v638_v7  ;;  %v652_v21 = vadd.f32 %v651_v14, %v650_v12  ;;  %v671_v22 = vsel %vm635_vm13, %v1618_v18, 0.0  ;;  %v1623_v23 = vsel %vm623_vm12, %v547_v19, %v601_v6 }
 0x16c   : > { %v660_v25 = vrot.slane %v659_v17, 2  ;;  %v672_v26 = vrot.slane %v671_v22, 4  ;;  %v664_v27 = vsel %vm635_vm13, %v1623_v23, 0.0  ;;  %v648_v29 = vrot.slane %v647_v16, 1 }
 0x16d   : > { %v653_v30 = vrot.slane %v652_v21, 2  ;;  %v665_v31 = vrot.slane %v664_v27, 4  ;;  %v1403_v32 = vpop.f32.mrb[6].mxu0  ;;  %v641_v33 = vrot.slane %v640_v20, 1 }
 0x16e   : > { %v661_v34 = vadd.f32 %v660_v25, %v659_v17  ;;  %v673_v35 = vadd.f32 %v672_v26, %v671_v22  ;;  %v1628_v36 = vsel %vm623_vm12, %v1403_v32, %v622_v24  ;;  %v557_v37 = vpop.f32.mrb[7].mxu0  ;;  %v649_v38 = vadd.f32 %v648_v29, %v647_v16  ;;  %v876_v22 = vld [vmem:[%s1806_s5] sm:$0xff]  ;;  %v879_v25 = vld [vmem:[%s1806_s5 + $0x18] sm:$0xff] }
 0x16f   : > { %v654_v39 = vadd.f32 %v653_v30, %v652_v21  ;;  %v666_v40 = vadd.f32 %v665_v31, %v664_v27  ;;  %v685_v41 = vsel %vm635_vm13, %v1628_v36, 0.0  ;;  %v630_v42 = vsel %vm623_vm12, %v557_v37, %v615_v28  ;;  %v880_v27 = vld [vmem:[%s1806_s5 + $0x20] sm:$0xff]  ;;  %v881_v28 = vld [vmem:[%s1806_s5 + $0x28] sm:$0xff]  ;;  %v882_v30 = vld [vmem:[%s1806_s5 + $0x30] sm:$0xff] }
 0x170   : > { %v674_v43 = vrot.slane %v673_v35, 2  ;;  %v686_v44 = vrot.slane %v685_v41, 4  ;;  %v678_v45 = vsel %vm635_vm13, %v630_v42, 0.0  ;;  %702 = vrot.lane.b32.xlu1 %v649_v38, %s1504_s27  ;;  %v642_v46 = vadd.f32 %v641_v33, %v640_v20  ;;  %v883_v31 = vld [vmem:[%s1806_s5 + $0x38] sm:$0xff]  ;;  %v1330_v33 = vld [vmem:[%s1805_s4] ss:$0 sm:$0xff] }
 0x171   : > { %v667_v47 = vrot.slane %v666_v40, 2  ;;  %v679_v48 = vrot.slane %v678_v45, 4  ;;  %v662_v49 = vrot.slane %v661_v34, 1  ;;  %v655_v50 = vrot.slane %v654_v39, 1 }
 0x172   : > { %v675_v51 = vadd.f32 %v674_v43, %v673_v35  ;;  %v687_v52 = vadd.f32 %v686_v44, %v685_v41  ;;  %700 = vrot.lane.b32.xlu0 %v642_v46, %s1504_s27  ;;  %v1466_v29 = vpack.c.bf16 %v881_v28, %v880_v27  ;;  %v1470_v32 = vpack.c.bf16 %v883_v31, %v882_v30 }
 0x173   : > { %v668_v53 = vadd.f32 %v667_v47, %v666_v40  ;;  %v680_v54 = vadd.f32 %v679_v48, %v678_v45  ;;  %v663_v55 = vadd.f32 %v662_v49, %v661_v34  ;;  %v656_v56 = vadd.f32 %v655_v50, %v654_v39 }
 0x174   : > { %v688_v57 = vrot.slane %v687_v52, 2  ;;  %v676_v59 = vrot.slane %v675_v51, 1 }
 0x175   : > { %v681_v60 = vrot.slane %v680_v54, 2  ;;  %706 = vrot.lane.b32.xlu1 %v663_v55, %s1504_s27  ;;  %v669_v62 = vrot.slane %v668_v53, 1 }
 0x176   : > { %v689_v63 = vadd.f32 %v688_v57, %v687_v52  ;;  %704 = vrot.lane.b32.xlu0 %v656_v56, %s1504_s27  ;;  %v677_v0 = vadd.f32 %v676_v59, %v675_v51 }
 0x177   : > { %v682_v1 = vadd.f32 %v681_v60, %v680_v54  ;;  %v670_v2 = vadd.f32 %v669_v62, %v668_v53 }
 0x178   : > { %v690_v3 = vrot.slane %v689_v63, 1 }
 0x179   : > { %710 = vrot.lane.b32.xlu1 %v677_v0, %s1504_s27  ;;  %v683_v5 = vrot.slane %v682_v1, 1 }
 0x17a   : > { %708 = vrot.lane.b32.xlu0 %v670_v2, %s1504_s27  ;;  %v691_v6 = vadd.f32 %v690_v3, %v689_v63 }
 0x17b   : > { %v684_v7 = vadd.f32 %v683_v5, %v682_v1 }
 0x17d   : > { %714 = vrot.lane.b32.xlu1 %v691_v6, %s1504_s27 }
 0x17e   : > { %712 = vrot.lane.b32.xlu0 %v684_v7, %s1504_s27 }
 0x1e2   : > { %v703_v8 = vpop.permute.xlu1 %702 }
 0x1e3   : > { %v725_v12 = vsel %vm635_vm13, %v1598_v58, %v703_v8 }
 0x1e4   : > { %v701_v10 = vpop.permute.xlu0 %700 }
 0x1e5   : > { %v724_v11 = vsel %vm635_vm13, %v1603_v61, %v701_v10 }
 0x1e6   : > { %1408 = vmatprep.mubr.msk.f32.mxu1 %vm738_vm14, %v724_v11 }
 0x1e7   : > { %v707_v13 = vpop.permute.xlu1 %706  ;;  %1409 = vmatmul.mubr.msk.f32.vlgmr.msra.gmra.mrb[0].mxu1 %vm738_vm14, %v725_v12 }
 0x1e8   : > { %v705_v14 = vpop.permute.xlu0 %704  ;;  %v727_v16 = vsel %vm635_vm13, %v1608_v4, %v707_v13 }
 0x1e9   : > { %v726_v15 = vsel %vm635_vm13, %v1613_v9, %v705_v14 }
 0x1ea   : > { %1411 = vmatprep.mubr.msk.f32.mxu1 %vm738_vm14, %v726_v15 }
 0x1eb   : > { %v711_v17 = vpop.permute.xlu1 %710  ;;  %1412 = vmatmul.mubr.msk.f32.gmra.mrb[2].mxu1 %vm738_vm14, %v727_v16 }
 0x1ec   : > { %v709_v61 = vpop.permute.xlu0 %708  ;;  %v729_v19 = vsel %vm635_vm13, %v1618_v18, %v711_v17  ;;  %v877_v18 = vld [vmem:[%s1806_s5 + $0x8] sm:$0xff] }
 0x1ed   : > { %v728_v58 = vsel %vm635_vm13, %v1623_v23, %v709_v61  ;;  %v878_v23 = vld [vmem:[%s1806_s5 + $0x10] sm:$0xff]  ;;  %v1458_v24 = vpack.c.bf16 %v877_v18, %v876_v22 }
 0x1ee   : > { %1414 = vmatprep.mubr.msk.f32.mxu1 %vm738_vm14, %v728_v58  ;;  %v1462_v26 = vpack.c.bf16 %v879_v25, %v878_v23 }
 0x1ef   : > { %v715_v20 = vpop.permute.xlu1 %714  ;;  %1415 = vmatmul.mubr.msk.f32.gmra.mrb[4].mxu1 %vm738_vm14, %v729_v19  ;;  %1459 = vmatprep.subr.bf16.mxu0 %v1458_v24 }
 0x1f0   : > { %v713_v9 = vpop.permute.xlu0 %712  ;;  %v731_v21 = vsel %vm635_vm13, %v1628_v36, %v715_v20  ;;  %1474 = vmatprep.subr.bf16.mxu1 %v1458_v24  ;;  %1461 = vmatpush3.bf16.msra.mxu0 %v1458_v24 }
 0x1f1   : > { %v730_v4 = vsel %vm635_vm13, %v630_v42, %v713_v9  ;;  %1478 = vmatpush3.bf16.msra.mxu1 %v1458_v24  ;;  %1463 = vmatprep.subr.bf16.mxu0 %v1462_v26 }
 0x1f2   : > { %1417 = vmatprep.mubr.msk.f32.mxu1 %vm738_vm14, %v730_v4  ;;  %1475 = vmatprep.subr.bf16.mxu1 %v1462_v26 }
 0x1f3   : > { %1418 = vmatmul.mubr.msk.f32.gmra.mrb[6].mxu1 %vm738_vm14, %v731_v21 }
 0x1f4   : > { %1465 = vmatpush3.bf16.msra.mxu0 %v1462_v26 }
 0x1f5   : > { %1479 = vmatpush3.bf16.msra.mxu1 %v1462_v26  ;;  %1467 = vmatprep.subr.bf16.mxu0 %v1466_v29 }
 0x1f6   : > { %1476 = vmatprep.subr.bf16.mxu1 %v1466_v29 }
 0x1f8   : > { %1469 = vmatpush3.bf16.msra.mxu0 %v1466_v29 }
 0x1f9   : > { %1480 = vmatpush3.bf16.msra.mxu1 %v1466_v29  ;;  %1471 = vmatprep.subr.bf16.mxu0 %v1470_v32 }
 0x1fa   : > { %1477 = vmatprep.subr.bf16.mxu1 %v1470_v32 }
 0x1fc   : > { %1473 = vmatpush3.bf16.msra.mxu0 %v1470_v32 }
 0x1fd   : > { %1481 = vmatpush3.bf16.msra.mxu1 %v1470_v32 }
 0x2ba   : > { %v1410_v34 = vpop.f32.mrb[0].mxu1 }
 0x2bb   : > { %v1692_v35 = vadd.f32 %v1410_v34, %v1330_v33  ;;  %v829_v36 = vpop.f32.mrb[1].mxu1 }
 0x2bc   : > { %v1694_v37 = vadd.f32 %v1330_v33, %v829_v36 }
 0x2bd   : > { %v869_v38 = vmax.f32 %v1692_v35, 0.0 }
 0x2be   : > { %v868_v39 = vmax.f32 %v1694_v37, 0.0  ;;  %v1413_v40 = vpop.f32.mrb[2].mxu1 }
 0x2bf   : > { %v893_v41 = vsel %vm885_vm15, %v869_v38, 0.0  ;;  %v1701_v42 = vadd.f32 %v1413_v40, %v1330_v33  ;;  %v839_v43 = vpop.f32.mrb[3].mxu1 }
 0x2c0   : > { %v894_v44 = vrot.slane %v893_v41, 4  ;;  %v886_v45 = vsel %vm885_vm15, %v868_v39, 0.0  ;;  %v1706_v46 = vadd.f32 %v1330_v33, %v839_v43 }
 0x2c1   : > { %v887_v47 = vrot.slane %v886_v45, 4  ;;  %v871_v48 = vmax.f32 %v1701_v42, 0.0 }
 0x2c2   : > { %v895_v49 = vadd.f32 %v894_v44, %v893_v41  ;;  %v870_v50 = vmax.f32 %v1706_v46, 0.0  ;;  %v1416_v51 = vpop.f32.mrb[4].mxu1 }
 0x2c3   : > { %v888_v52 = vadd.f32 %v887_v47, %v886_v45  ;;  %v907_v53 = vsel %vm885_vm15, %v871_v48, 0.0  ;;  %v1713_v54 = vadd.f32 %v1416_v51, %v1330_v33  ;;  %v849_v55 = vpop.f32.mrb[5].mxu1 }
 0x2c4   : > { %v896_v56 = vrot.slane %v895_v49, 2  ;;  %v908_v57 = vrot.slane %v907_v53, 4  ;;  %v900_v59 = vsel %vm885_vm15, %v870_v50, 0.0  ;;  %v1718_v60 = vadd.f32 %v1330_v33, %v849_v55 }
 0x2c5   : > { %v889_v62 = vrot.slane %v888_v52, 2  ;;  %v901_v63 = vrot.slane %v900_v59, 4  ;;  %v873_v0 = vmax.f32 %v1713_v54, 0.0 }
 0x2c6   : > { %v909_v1 = vadd.f32 %v908_v57, %v907_v53  ;;  %v872_v2 = vmax.f32 %v1718_v60, 0.0  ;;  %v1419_v3 = vpop.f32.mrb[6].mxu1  ;;  %v897_v5 = vadd.f32 %v896_v56, %v895_v49 }
 0x2c7   : > { %v902_v6 = vadd.f32 %v901_v63, %v900_v59  ;;  %v921_v7 = vsel %vm885_vm15, %v873_v0, 0.0  ;;  %v1725_v8 = vadd.f32 %v1419_v3, %v1330_v33  ;;  %v859_v10 = vpop.f32.mrb[7].mxu1  ;;  %v890_v11 = vadd.f32 %v889_v62, %v888_v52 }
 0x2c8   : > { %v910_v12 = vrot.slane %v909_v1, 2  ;;  %v922_v13 = vrot.slane %v921_v7, 4  ;;  %v914_v14 = vsel %vm885_vm15, %v872_v2, 0.0  ;;  %v1730_v15 = vadd.f32 %v1330_v33, %v859_v10 }
 0x2c9   : > { %v903_v16 = vrot.slane %v902_v6, 2  ;;  %v915_v17 = vrot.slane %v914_v14, 4  ;;  %v875_v61 = vmax.f32 %v1725_v8, 0.0  ;;  %v898_v58 = vrot.slane %v897_v5, 1 }
 0x2ca   : > { %v923_v19 = vadd.f32 %v922_v13, %v921_v7  ;;  %v874_v20 = vmax.f32 %v1730_v15, 0.0  ;;  %v891_v9 = vrot.slane %v890_v11, 1  ;;  %v911_v4 = vadd.f32 %v910_v12, %v909_v1 }
 0x2cb   : > { %v916_v21 = vadd.f32 %v915_v17, %v914_v14  ;;  %v935_v22 = vsel %vm885_vm15, %v875_v61, 0.0  ;;  %v899_v18 = vadd.f32 %v898_v58, %v897_v5  ;;  %v904_v23 = vadd.f32 %v903_v16, %v902_v6 }
 0x2cc   : > { %v924_v24 = vrot.slane %v923_v19, 2  ;;  %v936_v25 = vrot.slane %v935_v22, 4  ;;  %v928_v26 = vsel %vm885_vm15, %v874_v20, 0.0  ;;  %v892_v27 = vadd.f32 %v891_v9, %v890_v11 }
 0x2cd   : > { %v917_v28 = vrot.slane %v916_v21, 2  ;;  %v929_v29 = vrot.slane %v928_v26, 4  ;;  %952 = vrot.lane.b32.xlu1 %v899_v18, %s1505_s26  ;;  %v912_v30 = vrot.slane %v911_v4, 1  ;;  %v905_v41 = vrot.slane %v904_v23, 1 }
 0x2ce   : > { %v937_v31 = vadd.f32 %v936_v25, %v935_v22  ;;  %950 = vrot.lane.b32.xlu0 %v892_v27, %s1505_s26  ;;  %v925_v36 = vadd.f32 %v924_v24, %v923_v19 }
 0x2cf   : > { %v930_v32 = vadd.f32 %v929_v29, %v928_v26  ;;  %v913_v33 = vadd.f32 %v912_v30, %v911_v4  ;;  %v918_v34 = vadd.f32 %v917_v28, %v916_v21  ;;  %v906_v52 = vadd.f32 %v905_v41, %v904_v23 }
 0x2d0   : > { %v938_v40 = vrot.slane %v937_v31, 2  ;;  %v926_v47 = vrot.slane %v925_v36, 1 }
 0x2d1   : > { %v931_v43 = vrot.slane %v930_v32, 2  ;;  %v919_v44 = vrot.slane %v918_v34, 1 }
 0x2d2   : > { %956 = vrot.lane.b32.xlu0 %v913_v33, %s1505_s26  ;;  %v939_v51 = vadd.f32 %v938_v40, %v937_v31  ;;  %v927_v55 = vadd.f32 %v926_v47, %v925_v36  ;;  %v1778_v40 = vld [vmem:[%s1808_s7] ss:$0 sm:$0xff] }
 0x2d3   : > { %v920_v45 = vadd.f32 %v919_v44, %v918_v34  ;;  %v932_v49 = vadd.f32 %v931_v43, %v930_v32 }
 0x2d4   : > { %v940_v57 = vrot.slane %v939_v51, 1 }
 0x2d5   : > { %958 = vrot.lane.b32.xlu1 %v920_v45, %s1505_s26  ;;  %v933_v53 = vrot.slane %v932_v49, 1 }
 0x2d6   : > { %954 = vrot.lane.b32.xlu0 %v906_v52, %s1505_s26  ;;  %v941_v59 = vadd.f32 %v940_v57, %v939_v51 }
 0x2d7   : > { %v934_v56 = vadd.f32 %v933_v53, %v932_v49 }
 0x2d9   : > { %960 = vrot.lane.b32.xlu1 %v927_v55, %s1505_s26 }
 0x2da   : > { %962 = vrot.lane.b32.xlu0 %v934_v56, %s1505_s26 }
 0x2dd   : > { %964 = vrot.lane.b32.xlu1 %v941_v59, %s1505_s26 }
 0x33f   : > { %v953_v62 = vpop.permute.xlu1 %952 }
 0x340   : > { %v951_v63 = vpop.permute.xlu0 %950  ;;  %v975_v3 = vsel %vm885_vm15, %v869_v38, %v953_v62 }
 0x341   : > { %v974_v1 = vsel %vm885_vm15, %v868_v39, %v951_v63 }
 0x342   : > { %1436 = vmatprep.mubr.msk.f32.mxu0 %vm988_vm0, %v974_v1 }
 0x343   : > { %1437 = vmatmul.mubr.msk.f32.vlgmr.msra.gmra.mrb[8].mxu0 %vm988_vm0, %v975_v3 }
 0x344   : > { %v957_v5 = vpop.permute.xlu0 %956 }
 0x345   : > { %v977_v35 = vsel %vm885_vm15, %v871_v48, %v957_v5  ;;  %v1339_v48 = vld [vmem:[%s1807_s6] ss:$0 sm:$0xff] }
 0x347   : > { %v959_v6 = vpop.permute.xlu1 %958 }
 0x348   : > { %v978_v7 = vsel %vm885_vm15, %v872_v2, %v959_v6  ;;  %v955_v10 = vpop.permute.xlu0 %954 }
 0x349   : > { %v976_v37 = vsel %vm885_vm15, %v870_v50, %v955_v10  ;;  %1442 = vmatprep.mubr.msk.f32.mxu1 %vm988_vm0, %v978_v7 }
 0x34a   : > { %1439 = vmatprep.mubr.msk.f32.mxu0 %vm988_vm0, %v976_v37 }
 0x34b   : > { %1440 = vmatmul.mubr.msk.f32.gmra.mrb[10].mxu0 %vm988_vm0, %v977_v35  ;;  %v961_v38 = vpop.permute.xlu1 %960 }
 0x34c   : > { %v979_v39 = vsel %vm885_vm15, %v873_v0, %v961_v38  ;;  %v963_v60 = vpop.permute.xlu0 %962 }
 0x34d   : > { %v980_v46 = vsel %vm885_vm15, %v874_v20, %v963_v60  ;;  %1443 = vmatmul.mubr.msk.f32.vlgmr.msra.gmra.mrb[8].mxu1 %vm988_vm0, %v979_v39 }
 0x34e   : > { %1445 = vmatprep.mubr.msk.f32.mxu1 %vm988_vm0, %v980_v46 }
 0x34f   : > { %v965_v50 = vpop.permute.xlu1 %964 }
 0x350   : > { %v981_v42 = vsel %vm885_vm15, %v875_v61, %v965_v50 }
 0x351   : > { %1446 = vmatmul.mubr.msk.f32.gmra.mrb[10].mxu1 %vm988_vm0, %v981_v42 }
 0x416   : > { %v1438_v54 = vpop.f32.mrb[8].mxu0 }
 0x417   : > { %v1085_v0 = vadd.f32 %v1438_v54, %v1339_v48  ;;  %v1079_v2 = vpop.f32.mrb[9].mxu0 }
 0x418   : > { %v1080_v11 = vadd.f32 %v1339_v48, %v1079_v2 }
 0x419   : > { %v1119_v12 = vmax.f32 %v1085_v0, 0.0 }
 0x41a   : > { %v1118_v13 = vmax.f32 %v1080_v11, 0.0 }
 0x41b   : > { %v1133_v14 = vsel %vm738_vm14, %v1119_v12, 0.0 }
 0x41c   : > { %v1134_v15 = vrot.slane %v1133_v14, 4  ;;  %v1126_v16 = vsel %vm738_vm14, %v1118_v13, 0.0 }
 0x41d   : > { %v1127_v8 = vrot.slane %v1126_v16, 4 }
 0x41e   : > { %v1135_v17 = vadd.f32 %v1134_v15, %v1133_v14  ;;  %v1441_v61 = vpop.f32.mrb[10].mxu0 }
 0x41f   : > { %v1128_v58 = vadd.f32 %v1127_v8, %v1126_v16  ;;  %v1095_v19 = vadd.f32 %v1441_v61, %v1339_v48  ;;  %v1089_v20 = vpop.f32.mrb[11].mxu0 }
 0x420   : > { %v1136_v9 = vrot.slane %v1135_v17, 2  ;;  %v1090_v4 = vadd.f32 %v1339_v48, %v1089_v20  ;;  %v1444_v21 = vpop.f32.mrb[8].mxu1 }
 0x421   : > { %v1129_v22 = vrot.slane %v1128_v58, 2  ;;  %v1121_v18 = vmax.f32 %v1095_v19, 0.0  ;;  %v1105_v23 = vadd.f32 %v1444_v21, %v1339_v48  ;;  %v1099_v24 = vpop.f32.mrb[9].mxu1 }
 0x422   : > { %v1137_v25 = vadd.f32 %v1136_v9, %v1135_v17  ;;  %v1120_v26 = vmax.f32 %v1090_v4, 0.0  ;;  %v1100_v27 = vadd.f32 %v1339_v48, %v1099_v24 }
 0x423   : > { %v1130_v28 = vadd.f32 %v1129_v22, %v1128_v58  ;;  %v1147_v29 = vsel %vm738_vm14, %v1121_v18, 0.0  ;;  %v1123_v30 = vmax.f32 %v1105_v23, 0.0 }
 0x424   : > { %v1138_v31 = vrot.slane %v1137_v25, 1  ;;  %v1148_v32 = vrot.slane %v1147_v29, 4  ;;  %v1140_v33 = vsel %vm738_vm14, %v1120_v26, 0.0  ;;  %v1122_v34 = vmax.f32 %v1100_v27, 0.0  ;;  %v1447_v36 = vpop.f32.mrb[10].mxu1 }
 0x425   : > { %v1131_v41 = vrot.slane %v1130_v28, 1  ;;  %v1141_v43 = vrot.slane %v1140_v33, 4  ;;  %v1161_v44 = vsel %vm738_vm14, %v1123_v30, 0.0  ;;  %v1115_v45 = vadd.f32 %v1447_v36, %v1339_v48  ;;  %v1109_v47 = vpop.f32.mrb[11].mxu1 }
 0x426   : > { %v1139_v49 = vadd.f32 %v1138_v31, %v1137_v25  ;;  %v1149_v51 = vadd.f32 %v1148_v32, %v1147_v29  ;;  %v1162_v52 = vrot.slane %v1161_v44, 4  ;;  %v1154_v53 = vsel %vm738_vm14, %v1122_v34, 0.0 }
 0x427   : > { %v1132_v55 = vadd.f32 %v1131_v41, %v1130_v28  ;;  %v1142_v56 = vadd.f32 %v1141_v43, %v1140_v33  ;;  %v1155_v57 = vrot.slane %v1154_v53, 4  ;;  %v1125_v59 = vmax.f32 %v1115_v45, 0.0 }
 0x428   : > { %v1190_v62 = vmul.f32 %v1778_v40, %v1139_v49  ;;  %v1150_v63 = vrot.slane %v1149_v51, 2  ;;  %v1163_v1 = vadd.f32 %v1162_v52, %v1161_v44  ;;  %v1110_v3 = vadd.f32 %v1339_v48, %v1109_v47  ;;  %v1349_v52 = vld [vmem:[#allocation2] ss:$0 sm:$0xff] }
 0x429   : > { %v1189_v5 = vmul.f32 %v1778_v40, %v1132_v55  ;;  %v1143_v6 = vrot.slane %v1142_v56, 2  ;;  %v1156_v7 = vadd.f32 %v1155_v57, %v1154_v53  ;;  %v1175_v10 = vsel %vm738_vm14, %v1125_v59, 0.0 }
 0x42a   : > { %v1205_v37 = vrot.slane %v1190_v62, 7  ;;  %v1151_v35 = vadd.f32 %v1150_v63, %v1149_v51  ;;  %v1164_v38 = vrot.slane %v1163_v1, 2  ;;  %v1176_v39 = vrot.slane %v1175_v10, 4 }
 0x42b   : > { %v1144_v60 = vadd.f32 %v1143_v6, %v1142_v56  ;;  %v1157_v46 = vrot.slane %v1156_v7, 2  ;;  %v1124_v50 = vmax.f32 %v1110_v3, 0.0 }
 0x42c   : > { %v1207_v42 = vsel %vm1206_vm1, %v1205_v37, %v1189_v5  ;;  %v1152_v54 = vrot.slane %v1151_v35, 1  ;;  %v1165_v0 = vadd.f32 %v1164_v38, %v1163_v1  ;;  %v1177_v2 = vadd.f32 %v1176_v39, %v1175_v10 }
 0x42d   : > { %v1145_v11 = vrot.slane %v1144_v60, 1  ;;  %v1158_v48 = vadd.f32 %v1157_v46, %v1156_v7  ;;  %v1168_v12 = vsel %vm738_vm14, %v1124_v50, 0.0 }
 0x42e   : > { %v1153_v13 = vadd.f32 %v1152_v54, %v1151_v35  ;;  %v1166_v14 = vrot.slane %v1165_v0, 1  ;;  %v1178_v15 = vrot.slane %v1177_v2, 2  ;;  %v1169_v16 = vrot.slane %v1168_v12, 4 }
 0x42f   : > { %v1146_v8 = vadd.f32 %v1145_v11, %v1144_v60  ;;  %v1159_v17 = vrot.slane %v1158_v48, 1 }
 0x430   : > { %v1192_v61 = vmul.f32 %v1778_v40, %v1153_v13  ;;  %v1167_v58 = vadd.f32 %v1166_v14, %v1165_v0  ;;  %v1179_v19 = vadd.f32 %v1178_v15, %v1177_v2  ;;  %v1170_v20 = vadd.f32 %v1169_v16, %v1168_v12 }
 0x431   : > { %v1191_v9 = vmul.f32 %v1778_v40, %v1146_v8  ;;  %v1160_v4 = vadd.f32 %v1159_v17, %v1158_v48 }
 0x432   : > { %v1194_v21 = vmul.f32 %v1778_v40, %v1167_v58  ;;  %v1180_v22 = vrot.slane %v1179_v19, 1  ;;  %v1171_v18 = vrot.slane %v1170_v20, 2  ;;  %v1211_v25 = vrot.slane %v1192_v61, 5 }
 0x433   : > { %v1208_v23 = vrot.slane %v1191_v9, 6  ;;  %v1193_v24 = vmul.f32 %v1778_v40, %v1160_v4 }
 0x434   : > { %v1172_v26 = vadd.f32 %v1171_v18, %v1170_v20  ;;  %v1181_v28 = vadd.f32 %v1180_v22, %v1179_v19  ;;  %v1217_v32 = vrot.slane %v1194_v21, 3 }
 0x435   : > { %v1214_v27 = vrot.slane %v1193_v24, 4  ;;  %v1210_v29 = vsel %vm1209_vm2, %v1208_v23, %v1207_v42 }
 0x436   : > { %v1173_v30 = vrot.slane %v1172_v26, 1  ;;  %v1213_v31 = vsel %vm1212_vm3, %v1211_v25, %v1210_v29  ;;  %v1196_v41 = vmul.f32 %v1778_v40, %v1181_v28 }
 0x437   : > { %v1216_v33 = vsel %vm1215_vm4, %v1214_v27, %v1213_v31 }
 0x438   : > { %v1174_v34 = vadd.f32 %v1173_v30, %v1172_v26  ;;  %v1219_v36 = vsel %vm1218_vm5, %v1217_v32, %v1216_v33  ;;  %v1223_v45 = vrot.slane %v1196_v41, 1 }
 0x43a   : > { %v1195_v43 = vmul.f32 %v1778_v40, %v1174_v34 }
 0x43c   : > { %v1220_v44 = vrot.slane %v1195_v43, 2 }
 0x43e   : > { %v1222_v47 = vsel %vm1221_vm6, %v1220_v44, %v1219_v36 }
 0x43f   : > { %v1225_v49 = vsel %vm1224_vm7, %v1223_v45, %v1222_v47 }
 0x440   : > { %v1227_v51 = vsel %vm738_vm14, %v1225_v49, 0.0 }
 0x441   : > { %1228 = vadd.xlane.f32.xlu0 %v1227_v51 }
 0x4ce   : > { %v1229_v53 = vpop.xlane.xlu0 %1228 }
 0x4cf   : > { %v1237_v55 = vadd.f32 %v1349_v52, %v1229_v53 }
 0x4d1   : > { %1239 = vst.msk [vmem:[%s346_s13] sm:$0xff] %vm1238_vm8, %v1237_v55 }
 0x4d2 PF: > { %s21_s11 = sadd.s32 1, %s1500_s11  }
 0x4d3   : > { %p18_p4 = scmp.ge.s32.totalorder %s21_s11, 4  }
 0x4d5   :  { %20 = sbr.rel (!%p18_p4) target bundleno = 3 (0x3), region = 89 }

</bundles_post_ra>
